<compile_context>
chip_gen: v7x
topology: tpu7x:2x2x1
jax: 0.10.0
libtpu: 0.0.40
codegen_flags: <defaults>
</compile_context>

<pallas_src>
import math

import numpy as np
import jax
import jax.numpy as jnp
from jax.experimental import pallas as pl
from jax.experimental.pallas import tpu as pltpu

_LANES = 128
_TARGET_BLOCK_BYTES = 2 * 1024 * 1024   # ~2 MiB per buffer


def _round_up(v: int, m: int) -> int:
    return ((v + m - 1) // m) * m


# --------------------------------------------------------------------------- kernel

def _drop_path_kernel(x_ref, g_ref, o_ref):
    """o = x * gate for one (TB, TF) tile.

    x_ref : VMEM (TB, TF)  tile of the flattened (B, F) input
    g_ref : VMEM (TB, 1)   per-sample gate, already scaled by 1/keep_prob
    o_ref : VMEM (TB, TF)  output tile
    """
    # Multiply in the input dtype (bf16 stays bf16 on v6e/v7x); (TB,1) gate
    # broadcasts across the lane-dense tile — no mask is ever materialized.
    o_ref[...] = x_ref[...] * g_ref[...].astype(x_ref.dtype)


# --------------------------------------------------------------------------- wrapper

def drop_path(x, drop_prob: float = 0.0, training: bool = False,
              scale_by_keep: bool = True, *, key=None):
    """Pallas-TPU equivalent of the reference drop_path()."""
    if drop_prob == 0.0 or not training:
        return x  # identity, exactly like the PyTorch early return

    keep_prob = 1.0 - float(drop_prob)
    if key is None:
        # TODO(synk): callers should thread a fresh key per training step.
        key = jax.random.PRNGKey(0)

    B = x.shape[0]
    F = int(math.prod(x.shape[1:])) if x.ndim > 1 else 1

    # Per-sample Bernoulli(keep_prob) gate, pre-scaled by 1/keep_prob.
    gate = jax.random.bernoulli(key, p=keep_prob, shape=(B, 1)).astype(jnp.float32)
    if keep_prob > 0.0 and scale_by_keep:
        gate = gate / jnp.float32(keep_prob)

    x2 = x.reshape(B, F)  # collapsing reshape: no data movement

    # ---- tile sizing: wide, lane-dense, ~2 MiB per buffer -------------------
    itemsize = jnp.dtype(x.dtype).itemsize
    target_elems = max(_LANES, _TARGET_BLOCK_BYTES // itemsize)
    if F < _LANES:
        TF = F                                            # full-dim block
    else:
        TF = min(_round_up(F, _LANES), (target_elems // _LANES) * _LANES)
    rows_target = max(1, target_elems // TF)
    if B <= 8 or rows_target >= B:
        TB = B                                            # full batch per block
    else:
        TB = max(8, (rows_target // 8) * 8)               # multiple of 8 rows

    grid = (pl.cdiv(B, TB), pl.cdiv(F, TF))

    out = pl.pallas_call(
        _drop_path_kernel,
        out_shape=jax.ShapeDtypeStruct((B, F), x.dtype),
        grid=grid,
        in_specs=[
            pl.BlockSpec((TB, TF), lambda i, j: (i, j)),
            pl.BlockSpec((TB, 1), lambda i, j: (i, 0)),
        ],
        out_specs=pl.BlockSpec((TB, TF), lambda i, j: (i, j)),
        compiler_params=pltpu.CompilerParams(
            # Both axes independent -> grid steps can be sharded across the
            # two TensorCores of a v7x chip; harmless no-op on v5e/v6e.
            dimension_semantics=("parallel", "parallel")),
    )(x2, gate)

    return out.reshape(x.shape)


class DropPath:
    """Pallas-backed equivalent of the PyTorch DropPath module."""

    def __init__(self, drop_prob: float = 0.0, scale_by_keep: bool = True):
        self.drop_prob = drop_prob
        self.scale_by_keep = scale_by_keep
        self.training = True  # nn.Module default

    def train(self, mode: bool = True):
        self.training = mode
        return self

    def eval(self):
        return self.train(False)

    def __call__(self, x, *, key=None):
        return drop_path(x, self.drop_prob, self.training, self.scale_by_keep,
                         key=key)

    def extra_repr(self):
        return f"drop_prob={round(self.drop_prob, 3):0.3f}"


# --------------------------------------------------------------------------- main

if __name__ == "__main__":
    root = jax.random.PRNGKey(0)
    data_key, gate_key = jax.random.split(root)

    B, C, H, W = 8, 4, 16, 16
    x = jax.random.normal(data_key, (B, C, H, W), jnp.float32)

    drop_prob = 0.25
    keep_prob = 1.0 - drop_prob

    # --- training path: fused Pallas stochastic-depth kernel ----------------
    module = DropPath(drop_prob=drop_prob, scale_by_keep=True)  # training=True
    fwd_train = jax.jit(lambda t, k: module(t, key=k))
    y = fwd_train(x, gate_key)
    jax.block_until_ready(y)

    # --- eval path: identity (matches the torch early return) ---------------
    y_eval = module.eval()(x)
    jax.block_until_ready(y_eval)

    # ------------------------------- checks ----------------------------------
    assert y.shape == x.shape and y.dtype == x.dtype, (y.shape, y.dtype)
    assert bool(jnp.isfinite(y).all())
    assert bool(jnp.array_equal(y_eval, x)), "eval-mode DropPath must be identity"

    x_np = np.asarray(jax.device_get(x))
    y_np = np.asarray(jax.device_get(y))

    # Reference gate from the same key/probability the wrapper used.
    gate_ref = np.asarray(jax.device_get(
        jax.random.bernoulli(gate_key, p=keep_prob, shape=(B, 1)))).astype(np.float32)
    for i in range(B):
        if gate_ref[i, 0] > 0.5:
            expect = x_np[i] / keep_prob
        else:
            expect = np.zeros_like(x_np[i])
        assert np.allclose(y_np[i], expect, rtol=1e-5, atol=1e-5), \
            f"sample {i}: output does not match the per-sample gate"
        # Also check it is a valid stochastic-depth output regardless of gate value.
        dropped = np.allclose(y_np[i], 0.0)
        kept = np.allclose(y_np[i], x_np[i] / keep_prob, rtol=1e-5, atol=1e-5)
        assert dropped or kept, f"sample {i}: not a valid per-sample gate of x"

    print("KERNEL_OK")
</pallas_src>

<mosaic_0001>
module attributes {stable_mosaic.version = 11 : i64} {
  func.func @_drop_path_kernel(%arg0: i32, %arg1: i32, %arg2: memref<8x1024xf32, #tpu.memory_space<vmem>>, %arg3: memref<8x1xf32, #tpu.memory_space<vmem>>, %arg4: memref<8x1024xf32, #tpu.memory_space<vmem>>) attributes {dimension_semantics = [#tpu.dimension_semantics<parallel>, #tpu.dimension_semantics<parallel>], iteration_bounds = array<i64: 1, 1>, scalar_prefetch = 0 : i64, scratch_operands = 0 : i64, tpu.core_type = #tpu.core_type<tc>, window_params = [{transform_indices = @transform_0, window_bounds = array<i64: 8, 1024>}, {transform_indices = @transform_1, window_bounds = array<i64: 8, 1>}, {transform_indices = @transform_2, window_bounds = array<i64: 8, 1024>}]} {
    %c0 = arith.constant 0 : index
    %c0_0 = arith.constant 0 : index
    %0 = vector.load %arg2[%c0, %c0_0] : memref<8x1024xf32, #tpu.memory_space<vmem>>, vector<8x1024xf32>
    %c0_1 = arith.constant 0 : index
    %c0_2 = arith.constant 0 : index
    %1 = vector.load %arg3[%c0_1, %c0_2] : memref<8x1xf32, #tpu.memory_space<vmem>>, vector<8x1xf32>
    %2 = vector.broadcast %1 : vector<8x1xf32> to vector<8x1024xf32>
    %3 = arith.mulf %0, %2 : vector<8x1024xf32>
    %c0_3 = arith.constant 0 : index
    %c0_4 = arith.constant 0 : index
    %4 = vector.load %arg4[%c0_3, %c0_4] : memref<8x1024xf32, #tpu.memory_space<vmem>>, vector<8x1024xf32>
    tpu.vector_store %arg4[%c0_3, %c0_4], %3 {strides = array<i32>} : memref<8x1024xf32, #tpu.memory_space<vmem>>, vector<8x1024xf32>,
    return
  }
  func.func @transform_0(%arg0: i32, %arg1: i32) -> (i32, i32) {
    %c0_i32 = arith.constant 0 : i32
    return %arg0, %arg1 : i32, i32
  }
  func.func @transform_1(%arg0: i32, %arg1: i32) -> (i32, i32) {
    %c0_i32 = arith.constant 0 : i32
    %c0_i32_0 = arith.constant 0 : i32
    return %arg0, %c0_i32 : i32, i32
  }
  func.func @transform_2(%arg0: i32, %arg1: i32) -> (i32, i32) {
    %c0_i32 = arith.constant 0 : i32
    return %arg0, %arg1 : i32, i32
  }
}

</mosaic_0001>

<bundles_post_ra>
// kernel: _lambda_.1
= control target key start
LH: loop header
LB: loop body
LE: loop exit
PB: predicated region body
PF: predicated region fallthrough
CT: control target
= control target key end

     0   :  { %v47_v0 = vmov 0   ;;  %s114_s1 = inlined_call_operand.vmem [shape: f32[8,1], index: 1, kind: input, shape index: {}]   ;;  %s115_s0 = inlined_call_operand.vmem [shape: f32[8,1024], index: 0, kind: input, shape index: {}]   ;;  %s116_s2 = inlined_call_operand.vmem [shape: f32[8,1024], index: 2, kind: output, shape index: {}]  }
   0x1   :  { %46 = vset.pattern.permute.xlu0 %v47_v0  ;;  %v19_v1 = vld [vmem:[%s114_s1] sm:$0xff]  ;;  %v12_v3 = vld [vmem:[%s115_s0 + $0x8] sm:$0xff]  ;;  %v13_v4 = vld [vmem:[%s115_s0 + $0x10] sm:$0xff] }
   0x2   :  { %22 = vperm.xlu0 %46, %v19_v1   ;;  %v11_v2 = vld [vmem:[%s115_s0] sm:$0xff]  ;;  %v14_v5 = vld [vmem:[%s115_s0 + $0x18] sm:$0xff]  ;;  %v16_v7 = vld [vmem:[%s115_s0 + $0x28] sm:$0xff] }
   0x3   :  { %v15_v6 = vld [vmem:[%s115_s0 + $0x20] sm:$0xff]  ;;  %v17_v8 = vld [vmem:[%s115_s0 + $0x30] sm:$0xff]  ;;  %v18_v9 = vld [vmem:[%s115_s0 + $0x38] sm:$0xff] }
  0x81   :  { %v23_v10 = vpop.permute.xlu0 %22 }
  0x82   :  { %v25_v11 = vmul.f32 %v23_v10, %v11_v2  ;;  %v26_v12 = vmul.f32 %v23_v10, %v12_v3  ;;  %v27_v13 = vmul.f32 %v23_v10, %v13_v4  ;;  %v28_v14 = vmul.f32 %v23_v10, %v14_v5 }
  0x83   :  { %v29_v15 = vmul.f32 %v23_v10, %v15_v6  ;;  %v30_v16 = vmul.f32 %v23_v10, %v16_v7  ;;  %v31_v17 = vmul.f32 %v23_v10, %v17_v8  ;;  %v32_v18 = vmul.f32 %v23_v10, %v18_v9 }
  0x84   :  { %33 = vst [vmem:[%s116_s2] sm:$0xff] %v25_v11  ;;  %34 = vst [vmem:[%s116_s2 + $0x8] sm:$0xff] %v26_v12 }
  0x85   :  { %35 = vst [vmem:[%s116_s2 + $0x10] sm:$0xff] %v27_v13  ;;  %36 = vst [vmem:[%s116_s2 + $0x18] sm:$0xff] %v28_v14 }
  0x86   :  { %37 = vst [vmem:[%s116_s2 + $0x20] sm:$0xff] %v29_v15  ;;  %38 = vst [vmem:[%s116_s2 + $0x28] sm:$0xff] %v30_v16 }
  0x87   :  { %39 = vst [vmem:[%s116_s2 + $0x30] sm:$0xff] %v31_v17  ;;  %40 = vst [vmem:[%s116_s2 + $0x38] sm:$0xff] %v32_v18 }

</bundles_post_ra>
